<compile_context>
chip_gen: v5e
topology: v5e:2x2
jax: 0.10.0
libtpu: 0.0.40
codegen_flags: <defaults>
</compile_context>

<pallas_src>
import functools

import jax
import jax.numpy as jnp
from jax.experimental import pallas as pl
from jax.experimental.pallas import tpu as pltpu

FEAT_DIM = 2048
SUBLANE = 8


def _round_up(x, m):
    return ((x + m - 1) // m) * m


def fc_kernel(x_ref, w_ref, b_ref, o_ref):
    # x_ref: (TB, K)   w_ref: (K, N)   b_ref: (1, N) f32   o_ref: (TB, N)
    x = x_ref[...]
    w = w_ref[...]
    if w.dtype != x.dtype:
        # Weight-only low-precision storage: upcast the tiny (K, N) weight in
        # VMEM (free VPU work hidden under the activation DMA).
        w = w.astype(x.dtype)
    acc = jnp.dot(x, w, preferred_element_type=jnp.float32)
    o_ref[...] = (acc + b_ref[...]).astype(o_ref.dtype)


def prepare_fc_params(weight, bias, weight_dtype=None):
    """One-time prep: transpose PyTorch-layout (N, K) weight to (K, N); bias to
    (1, N) f32.  No padding -- the kernel handles the narrow class dim.
    Optionally store the weight in a narrower dtype (e.g. bf16); activations
    and accumulation stay f32 (weight is upcast in-kernel)."""
    w_t = weight.T
    if weight_dtype is not None:
        w_t = w_t.astype(weight_dtype)
    b2d = bias.astype(jnp.float32).reshape(1, -1)
    return w_t, b2d


@functools.partial(jax.jit, static_argnames=("tile_b",))
def linear_classifier_forward(features, w_t, b2d, *, tile_b=512):
    """features: (B, 2048); w_t: (2048, num_classes); b2d: (1, num_classes).
    Returns (B, num_classes) logits in features.dtype."""
    B, K = features.shape
    N = w_t.shape[1]
    out_dtype = features.dtype

    # Batch tile: multiple of 8 sublanes.  For B >= 16 guarantee >= 2 grid
    # steps so the "parallel" batch axis spans both TensorCores on v7x.
    if B >= 2 * SUBLANE:
        tb_cap = _round_up(-(-B // 2), SUBLANE)
    else:
        tb_cap = _round_up(B, SUBLANE)
    TB = max(SUBLANE, min(_round_up(tile_b, SUBLANE), tb_cap))

    grid = (pl.cdiv(B, TB),)  # ragged edge block handled by Pallas masking

    bytes_accessed = (B * K * features.dtype.itemsize
                      + K * N * w_t.dtype.itemsize
                      + N * 4
                      + B * N * jnp.dtype(out_dtype).itemsize)

    return pl.pallas_call(
        fc_kernel,
        out_shape=jax.ShapeDtypeStruct((B, N), out_dtype),
        grid=grid,
        in_specs=[
            pl.BlockSpec((TB, K), lambda i: (i, 0)),   # activation tile
            pl.BlockSpec((K, N), lambda i: (0, 0)),    # resident, unpadded weight
            pl.BlockSpec((1, N), lambda i: (0, 0)),    # resident bias
        ],
        out_specs=pl.BlockSpec((TB, N), lambda i: (i, 0)),
        compiler_params=pltpu.CompilerParams(
            dimension_semantics=("parallel",)),
        cost_estimate=pl.CostEstimate(
            flops=2 * B * K * N,
            transcendentals=0,
            bytes_accessed=bytes_accessed),
    )(features, w_t, b2d)


if __name__ == "__main__":
    num_classes = 2
    feat_dim = FEAT_DIM  # fixed by the module's __init__
    batch = 8

    key = jax.random.PRNGKey(0)
    k_x, k_w, k_b = jax.random.split(key, 3)

    # Deterministic synthetic parameters (PyTorch Linear default init style:
    # uniform(-1/sqrt(feat_dim), 1/sqrt(feat_dim))).
    bound = 1.0 / (feat_dim ** 0.5)
    weight = jax.random.uniform(k_w, (num_classes, feat_dim), jnp.float32,
                                minval=-bound, maxval=bound)
    bias = jax.random.uniform(k_b, (num_classes,), jnp.float32,
                              minval=-bound, maxval=bound)
    features = jax.random.normal(k_x, (batch, feat_dim), jnp.float32)

    ref = features @ weight.T + bias

    # --- f32 path (default, tight check) ----------------------------------
    w_t, b2d = prepare_fc_params(weight, bias)
    out = jax.block_until_ready(linear_classifier_forward(features, w_t, b2d))
    assert out.shape == (batch, num_classes)
    assert jnp.allclose(out, ref, atol=1e-4, rtol=1e-4)

    # --- ragged / multi-step batch (exercises boundary masking and the
    #     >=2-grid-step path used to split across v7x's two TCs) ------------
    batch2 = 20
    features2 = jax.random.normal(jax.random.PRNGKey(1), (batch2, feat_dim),
                                  jnp.float32)
    ref2 = features2 @ weight.T + bias
    out2 = jax.block_until_ready(
        linear_classifier_forward(features2, w_t, b2d))
    assert out2.shape == (batch2, num_classes)
    assert jnp.allclose(out2, ref2, atol=1e-4, rtol=1e-4)

    # --- weight-only bf16 storage (in-kernel upcast, f32 activations/acc) --
    w_t_bf16, b2d_bf = prepare_fc_params(weight, bias,
                                         weight_dtype=jnp.bfloat16)
    out_bf = jax.block_until_ready(
        linear_classifier_forward(features, w_t_bf16, b2d_bf))
    assert out_bf.shape == (batch, num_classes)
    assert jnp.allclose(out_bf, ref, atol=5e-2, rtol=5e-2)

    # TODO(synk): the unused `logits()` path (relu + adaptive_avg_pool2d on an
    # NCHW tensor) is not part of forward() and is not implemented here.

    print("KERNEL_OK")
</pallas_src>

<mosaic_0001>
module attributes {stable_mosaic.version = 11 : i64} {
  func.func @fc_kernel(%arg0: i32, %arg1: memref<8x2048xf32, #tpu.memory_space<vmem>>, %arg2: memref<2048x2xf32, #tpu.memory_space<vmem>>, %arg3: memref<1x2xf32, #tpu.memory_space<vmem>>, %arg4: memref<8x2xf32, #tpu.memory_space<vmem>>) attributes {dimension_semantics = [#tpu.dimension_semantics<parallel>], iteration_bounds = array<i64: 1>, scalar_prefetch = 0 : i64, scratch_operands = 0 : i64, tpu.core_type = #tpu.core_type<tc>, window_params = [{transform_indices = @transform_0, window_bounds = array<i64: 8, 2048>}, {pipeline_mode = #tpu.pipeline_mode<synchronous>, transform_indices = @transform_1, window_bounds = array<i64: 2048, 2>}, {pipeline_mode = #tpu.pipeline_mode<synchronous>, transform_indices = @transform_2, window_bounds = array<i64: 1, 2>}, {transform_indices = @transform_3, window_bounds = array<i64: 8, 2>}]} {
    %c0 = arith.constant 0 : index
    %c0_0 = arith.constant 0 : index
    %0 = vector.load %arg1[%c0, %c0_0] : memref<8x2048xf32, #tpu.memory_space<vmem>>, vector<8x2048xf32>
    %c0_1 = arith.constant 0 : index
    %c0_2 = arith.constant 0 : index
    %1 = vector.load %arg2[%c0_1, %c0_2] : memref<2048x2xf32, #tpu.memory_space<vmem>>, vector<2048x2xf32>
    %cst = arith.constant dense<0.000000e+00> : vector<8x2xf32>
    %2 = tpu.matmul %0, %1, %cst {dimension_numbers = #tpu.dot_dimension_numbers<[1], [0], [0], [1], [0, 0, 1, 1], [], []>} : vector<8x2048xf32>, vector<2048x2xf32>, vector<8x2xf32> -> vector<8x2xf32>
    %c0_3 = arith.constant 0 : index
    %c0_4 = arith.constant 0 : index
    %3 = vector.load %arg3[%c0_3, %c0_4] : memref<1x2xf32, #tpu.memory_space<vmem>>, vector<1x2xf32>
    %4 = vector.broadcast %3 : vector<1x2xf32> to vector<8x2xf32>
    %5 = arith.addf %2, %4 : vector<8x2xf32>
    %c0_5 = arith.constant 0 : index
    %c0_6 = arith.constant 0 : index
    %6 = vector.load %arg4[%c0_5, %c0_6] : memref<8x2xf32, #tpu.memory_space<vmem>>, vector<8x2xf32>
    tpu.vector_store %arg4[%c0_5, %c0_6], %5 {strides = array<i32>} : memref<8x2xf32, #tpu.memory_space<vmem>>, vector<8x2xf32>,
    return
  }
  func.func @transform_0(%arg0: i32) -> (i32, i32) {
    %c0_i32 = arith.constant 0 : i32
    %c0_i32_0 = arith.constant 0 : i32
    return %arg0, %c0_i32 : i32, i32
  }
  func.func @transform_1(%arg0: i32) -> (i32, i32) {
    %c0_i32 = arith.constant 0 : i32
    %c0_i32_0 = arith.constant 0 : i32
    %c0_i32_1 = arith.constant 0 : i32
    return %c0_i32, %c0_i32_0 : i32, i32
  }
  func.func @transform_2(%arg0: i32) -> (i32, i32) {
    %c0_i32 = arith.constant 0 : i32
    %c0_i32_0 = arith.constant 0 : i32
    %c0_i32_1 = arith.constant 0 : i32
    return %c0_i32, %c0_i32_0 : i32, i32
  }
  func.func @transform_3(%arg0: i32) -> (i32, i32) {
    %c0_i32 = arith.constant 0 : i32
    %c0_i32_0 = arith.constant 0 : i32
    return %arg0, %c0_i32 : i32, i32
  }
}

</mosaic_0001>

<bundles_post_ra>
// kernel: linear_classifier_forward.1
= control target key start
LH: loop header
LB: loop body
LE: loop exit
PB: predicated region body
PF: predicated region fallthrough
CT: control target
= control target key end

     0   :  { %vm610_vm0 = vcmask 15360   ;;  %s1459_s1 = inlined_call_operand.vmem [shape: f32[2048,2], index: 1, kind: input, shape index: {}]   ;;  %s1460_s0 = inlined_call_operand.vmem [shape: f32[8,2048], index: 0, kind: input, shape index: {}]   ;;  %s1461_s2 = inlined_call_operand.vmem [shape: f32[1,2], index: 2, kind: input, shape index: {}]   ;;  %s1462_s3 = inlined_call_operand.vmem [shape: f32[8,2], index: 3, kind: output, shape index: {}]  }
   0x1   :  { %v45_v0 = vld [vmem:[%s1459_s1 + $0x78] sm:$0xff]  ;;  %v44_v2 = vld [vmem:[%s1459_s1 + $0x70] sm:$0xff]  ;;  %v43_v6 = vld [vmem:[%s1459_s1 + $0x68] sm:$0xff] }
   0x2   :  { %v77_v1 = vld [vmem:[%s1459_s1 + $0x178] sm:$0xff]  ;;  %290 = vmatpush.msra.mxu0 %v45_v0  ;;  %v76_v4 = vld [vmem:[%s1459_s1 + $0x170] sm:$0xff]  ;;  %v75_v8 = vld [vmem:[%s1459_s1 + $0x168] sm:$0xff] }
   0x3   :  { %330 = vmatpush.msra.mxu2 %v77_v1  ;;  %v61_v3 = vld [vmem:[%s1459_s1 + $0xf8] sm:$0xff]  ;;  %v60_v7 = vld [vmem:[%s1459_s1 + $0xf0] sm:$0xff]  ;;  %v59_v10 = vld [vmem:[%s1459_s1 + $0xe8] sm:$0xff] }
   0x4   :  { %v93_v5 = vld [vmem:[%s1459_s1 + $0x1f8] sm:$0xff]  ;;  %310 = vmatpush.msra.mxu1 %v61_v3  ;;  %291 = vmatpush.msra.mxu0 %v44_v2  ;;  %v92_v9 = vld [vmem:[%s1459_s1 + $0x1f0] sm:$0xff]  ;;  %v42_v11 = vld [vmem:[%s1459_s1 + $0x60] sm:$0xff] }
   0x5   :  { %350 = vmatpush.msra.mxu3 %v93_v5  ;;  %331 = vmatpush.msra.mxu2 %v76_v4  ;;  %v74_v12 = vld [vmem:[%s1459_s1 + $0x160] sm:$0xff]  ;;  %v91_v13 = vld [vmem:[%s1459_s1 + $0x1e8] sm:$0xff]  ;;  %v41_v16 = vld [vmem:[%s1459_s1 + $0x58] sm:$0xff] }
   0x6   :  { %311 = vmatpush.msra.mxu1 %v60_v7  ;;  %292 = vmatpush.msra.mxu0 %v43_v6  ;;  %v58_v14 = vld [vmem:[%s1459_s1 + $0xe0] sm:$0xff]  ;;  %v73_v17 = vld [vmem:[%s1459_s1 + $0x158] sm:$0xff]  ;;  %v40_v20 = vld [vmem:[%s1459_s1 + $0x50] sm:$0xff] }
   0x7   :  { %351 = vmatpush.msra.mxu3 %v92_v9  ;;  %332 = vmatpush.msra.mxu2 %v75_v8  ;;  %v90_v15 = vld [vmem:[%s1459_s1 + $0x1e0] sm:$0xff]  ;;  %v57_v18 = vld [vmem:[%s1459_s1 + $0xd8] sm:$0xff]  ;;  %v72_v21 = vld [vmem:[%s1459_s1 + $0x150] sm:$0xff] }
   0x8   :  { %312 = vmatpush.msra.mxu1 %v59_v10  ;;  %293 = vmatpush.msra.mxu0 %v42_v11  ;;  %v89_v19 = vld [vmem:[%s1459_s1 + $0x1d8] sm:$0xff]  ;;  %v56_v22 = vld [vmem:[%s1459_s1 + $0xd0] sm:$0xff]  ;;  %v39_v24 = vld [vmem:[%s1459_s1 + $0x48] sm:$0xff] }
   0x9   :  { %352 = vmatpush.msra.mxu3 %v91_v13  ;;  %333 = vmatpush.msra.mxu2 %v74_v12  ;;  %v88_v23 = vld [vmem:[%s1459_s1 + $0x1d0] sm:$0xff]  ;;  %v71_v25 = vld [vmem:[%s1459_s1 + $0x148] sm:$0xff]  ;;  %v38_v28 = vld [vmem:[%s1459_s1 + $0x40] sm:$0xff] }
   0xa   :  { %313 = vmatpush.msra.mxu1 %v58_v14  ;;  %294 = vmatpush.msra.mxu0 %v41_v16  ;;  %v55_v26 = vld [vmem:[%s1459_s1 + $0xc8] sm:$0xff]  ;;  %v70_v29 = vld [vmem:[%s1459_s1 + $0x140] sm:$0xff]  ;;  %v37_v32 = vld [vmem:[%s1459_s1 + $0x38] sm:$0xff] }
   0xb   :  { %353 = vmatpush.msra.mxu3 %v90_v15  ;;  %334 = vmatpush.msra.mxu2 %v73_v17  ;;  %v87_v27 = vld [vmem:[%s1459_s1 + $0x1c8] sm:$0xff]  ;;  %v54_v30 = vld [vmem:[%s1459_s1 + $0xc0] sm:$0xff]  ;;  %v69_v33 = vld [vmem:[%s1459_s1 + $0x138] sm:$0xff] }
   0xc   :  { %314 = vmatpush.msra.mxu1 %v57_v18  ;;  %295 = vmatpush.msra.mxu0 %v40_v20  ;;  %v86_v31 = vld [vmem:[%s1459_s1 + $0x1c0] sm:$0xff]  ;;  %v53_v34 = vld [vmem:[%s1459_s1 + $0xb8] sm:$0xff]  ;;  %v36_v36 = vld [vmem:[%s1459_s1 + $0x30] sm:$0xff] }
   0xd   :  { %354 = vmatpush.msra.mxu3 %v89_v19  ;;  %335 = vmatpush.msra.mxu2 %v72_v21  ;;  %v85_v35 = vld [vmem:[%s1459_s1 + $0x1b8] sm:$0xff]  ;;  %v68_v37 = vld [vmem:[%s1459_s1 + $0x130] sm:$0xff]  ;;  %v35_v40 = vld [vmem:[%s1459_s1 + $0x28] sm:$0xff] }
   0xe   :  { %315 = vmatpush.msra.mxu1 %v56_v22  ;;  %296 = vmatpush.msra.mxu0 %v39_v24  ;;  %v52_v38 = vld [vmem:[%s1459_s1 + $0xb0] sm:$0xff]  ;;  %v67_v41 = vld [vmem:[%s1459_s1 + $0x128] sm:$0xff]  ;;  %v34_v44 = vld [vmem:[%s1459_s1 + $0x20] sm:$0xff] }
   0xf   :  { %355 = vmatpush.msra.mxu3 %v88_v23  ;;  %336 = vmatpush.msra.mxu2 %v71_v25  ;;  %v84_v39 = vld [vmem:[%s1459_s1 + $0x1b0] sm:$0xff]  ;;  %v51_v42 = vld [vmem:[%s1459_s1 + $0xa8] sm:$0xff]  ;;  %v66_v45 = vld [vmem:[%s1459_s1 + $0x120] sm:$0xff] }
  0x10   :  { %316 = vmatpush.msra.mxu1 %v55_v26  ;;  %297 = vmatpush.msra.mxu0 %v38_v28  ;;  %v83_v43 = vld [vmem:[%s1459_s1 + $0x1a8] sm:$0xff]  ;;  %v50_v46 = vld [vmem:[%s1459_s1 + $0xa0] sm:$0xff]  ;;  %v33_v48 = vld [vmem:[%s1459_s1 + $0x18] sm:$0xff] }
  0x11   :  { %356 = vmatpush.msra.mxu3 %v87_v27  ;;  %337 = vmatpush.msra.mxu2 %v70_v29  ;;  %v82_v47 = vld [vmem:[%s1459_s1 + $0x1a0] sm:$0xff]  ;;  %v65_v49 = vld [vmem:[%s1459_s1 + $0x118] sm:$0xff]  ;;  %v32_v52 = vld [vmem:[%s1459_s1 + $0x10] sm:$0xff] }
  0x12   :  { %317 = vmatpush.msra.mxu1 %v54_v30  ;;  %298 = vmatpush.msra.mxu0 %v37_v32  ;;  %v49_v50 = vld [vmem:[%s1459_s1 + $0x98] sm:$0xff]  ;;  %v64_v53 = vld [vmem:[%s1459_s1 + $0x110] sm:$0xff]  ;;  %v31_v56 = vld [vmem:[%s1459_s1 + $0x8] sm:$0xff] }
  0x13   :  { %357 = vmatpush.msra.mxu3 %v86_v31  ;;  %338 = vmatpush.msra.mxu2 %v69_v33  ;;  %v81_v51 = vld [vmem:[%s1459_s1 + $0x198] sm:$0xff]  ;;  %v48_v54 = vld [vmem:[%s1459_s1 + $0x90] sm:$0xff]  ;;  %v63_v57 = vld [vmem:[%s1459_s1 + $0x108] sm:$0xff] }
  0x14   :  { %318 = vmatpush.msra.mxu1 %v53_v34  ;;  %299 = vmatpush.msra.mxu0 %v36_v36  ;;  %v80_v55 = vld [vmem:[%s1459_s1 + $0x190] sm:$0xff]  ;;  %v47_v58 = vld [vmem:[%s1459_s1 + $0x88] sm:$0xff]  ;;  %v30_v60 = vld [vmem:[%s1459_s1] sm:$0xff] }
  0x15   :  { %358 = vmatpush.msra.mxu3 %v85_v35  ;;  %339 = vmatpush.msra.mxu2 %v68_v37  ;;  %v79_v59 = vld [vmem:[%s1459_s1 + $0x188] sm:$0xff]  ;;  %v62_v61 = vld [vmem:[%s1459_s1 + $0x100] sm:$0xff]  ;;  %v109_v62 = vld [vmem:[%s1459_s1 + $0x278] sm:$0xff] }
  0x16   :  { %319 = vmatpush.msra.mxu1 %v52_v38  ;;  %300 = vmatpush.msra.mxu0 %v35_v40  ;;  %v141_v63 = vld [vmem:[%s1459_s1 + $0x378] sm:$0xff]  ;;  %v46_v0 = vld [vmem:[%s1459_s1 + $0x80] sm:$0xff]  ;;  %v108_v2 = vld [vmem:[%s1459_s1 + $0x270] sm:$0xff] }
  0x17   :  { %359 = vmatpush.msra.mxu3 %v84_v39  ;;  %340 = vmatpush.msra.mxu2 %v67_v41  ;;  %v78_v1 = vld [vmem:[%s1459_s1 + $0x180] sm:$0xff]  ;;  %v125_v3 = vld [vmem:[%s1459_s1 + $0x2f8] sm:$0xff]  ;;  %v140_v4 = vld [vmem:[%s1459_s1 + $0x370] sm:$0xff] }
  0x18   :  { %320 = vmatpush.msra.mxu1 %v51_v42  ;;  %301 = vmatpush.msra.mxu0 %v34_v44  ;;  %v157_v5 = vld [vmem:[%s1459_s1 + $0x3f8] sm:$0xff]  ;;  %v107_v6 = vld [vmem:[%s1459_s1 + $0x268] sm:$0xff]  ;;  %v124_v7 = vld [vmem:[%s1459_s1 + $0x2f0] sm:$0xff] }
  0x19   :  { %360 = vmatpush.msra.mxu3 %v83_v43  ;;  %341 = vmatpush.msra.mxu2 %v66_v45  ;;  %v139_v8 = vld [vmem:[%s1459_s1 + $0x368] sm:$0xff]  ;;  %v156_v9 = vld [vmem:[%s1459_s1 + $0x3f0] sm:$0xff]  ;;  %v106_v10 = vld [vmem:[%s1459_s1 + $0x260] sm:$0xff] }
  0x1a   :  { %321 = vmatpush.msra.mxu1 %v50_v46  ;;  %302 = vmatpush.msra.mxu0 %v33_v48  ;;  %v123_v11 = vld [vmem:[%s1459_s1 + $0x2e8] sm:$0xff]  ;;  %v138_v12 = vld [vmem:[%s1459_s1 + $0x360] sm:$0xff]  ;;  %v105_v14 = vld [vmem:[%s1459_s1 + $0x258] sm:$0xff] }
  0x1b   :  { %361 = vmatpush.msra.mxu3 %v82_v47  ;;  %342 = vmatpush.msra.mxu2 %v65_v49  ;;  %v155_v13 = vld [vmem:[%s1459_s1 + $0x3e8] sm:$0xff]  ;;  %v122_v15 = vld [vmem:[%s1459_s1 + $0x2e0] sm:$0xff]  ;;  %v137_v16 = vld [vmem:[%s1459_s1 + $0x358] sm:$0xff] }
  0x1c   :  { %322 = vmatpush.msra.mxu1 %v49_v50  ;;  %303 = vmatpush.msra.mxu0 %v32_v52  ;;  %v154_v17 = vld [vmem:[%s1459_s1 + $0x3e0] sm:$0xff]  ;;  %v104_v18 = vld [vmem:[%s1459_s1 + $0x250] sm:$0xff]  ;;  %v121_v19 = vld [vmem:[%s1459_s1 + $0x2d8] sm:$0xff] }
  0x1d   :  { %362 = vmatpush.msra.mxu3 %v81_v51  ;;  %343 = vmatpush.msra.mxu2 %v64_v53  ;;  %v136_v20 = vld [vmem:[%s1459_s1 + $0x350] sm:$0xff]  ;;  %v153_v21 = vld [vmem:[%s1459_s1 + $0x3d8] sm:$0xff]  ;;  %v103_v22 = vld [vmem:[%s1459_s1 + $0x248] sm:$0xff] }
  0x1e   :  { %323 = vmatpush.msra.mxu1 %v48_v54  ;;  %304 = vmatpush.msra.mxu0 %v31_v56  ;;  %v120_v23 = vld [vmem:[%s1459_s1 + $0x2d0] sm:$0xff]  ;;  %v135_v24 = vld [vmem:[%s1459_s1 + $0x348] sm:$0xff]  ;;  %v102_v26 = vld [vmem:[%s1459_s1 + $0x240] sm:$0xff] }
  0x1f   :  { %363 = vmatpush.msra.mxu3 %v80_v55  ;;  %344 = vmatpush.msra.mxu2 %v63_v57  ;;  %v152_v25 = vld [vmem:[%s1459_s1 + $0x3d0] sm:$0xff]  ;;  %v119_v27 = vld [vmem:[%s1459_s1 + $0x2c8] sm:$0xff]  ;;  %v134_v28 = vld [vmem:[%s1459_s1 + $0x340] sm:$0xff] }
  0x20   :  { %324 = vmatpush.msra.mxu1 %v47_v58  ;;  %305 = vmatpush.msra.mxu0 %v30_v60  ;;  %v151_v29 = vld [vmem:[%s1459_s1 + $0x3c8] sm:$0xff]  ;;  %v101_v30 = vld [vmem:[%s1459_s1 + $0x238] sm:$0xff]  ;;  %v118_v31 = vld [vmem:[%s1459_s1 + $0x2c0] sm:$0xff] }
  0x21   :  { %364 = vmatpush.msra.mxu3 %v79_v59  ;;  %345 = vmatpush.msra.mxu2 %v62_v61  ;;  %v133_v32 = vld [vmem:[%s1459_s1 + $0x338] sm:$0xff]  ;;  %v150_v33 = vld [vmem:[%s1459_s1 + $0x3c0] sm:$0xff]  ;;  %v100_v34 = vld [vmem:[%s1459_s1 + $0x230] sm:$0xff] }
  0x22   :  { %370 = vmatpush.msrb.mxu0 %v109_v62  ;;  %325 = vmatpush.msra.mxu1 %v46_v0  ;;  %v117_v35 = vld [vmem:[%s1459_s1 + $0x2b8] sm:$0xff]  ;;  %v132_v36 = vld [vmem:[%s1459_s1 + $0x330] sm:$0xff]  ;;  %v99_v38 = vld [vmem:[%s1459_s1 + $0x228] sm:$0xff] }
  0x23   :  { %410 = vmatpush.msrb.mxu2 %v141_v63  ;;  %365 = vmatpush.msra.mxu3 %v78_v1  ;;  %v149_v37 = vld [vmem:[%s1459_s1 + $0x3b8] sm:$0xff]  ;;  %v116_v39 = vld [vmem:[%s1459_s1 + $0x2b0] sm:$0xff]  ;;  %v131_v40 = vld [vmem:[%s1459_s1 + $0x328] sm:$0xff] }
  0x24   :  { %371 = vmatpush.msrb.mxu0 %v108_v2  ;;  %390 = vmatpush.msrb.mxu1 %v125_v3  ;;  %v148_v41 = vld [vmem:[%s1459_s1 + $0x3b0] sm:$0xff]  ;;  %v98_v42 = vld [vmem:[%s1459_s1 + $0x220] sm:$0xff]  ;;  %v115_v43 = vld [vmem:[%s1459_s1 + $0x2a8] sm:$0xff] }
  0x25   :  { %411 = vmatpush.msrb.mxu2 %v140_v4  ;;  %430 = vmatpush.msrb.mxu3 %v157_v5  ;;  %v130_v44 = vld [vmem:[%s1459_s1 + $0x320] sm:$0xff]  ;;  %v147_v45 = vld [vmem:[%s1459_s1 + $0x3a8] sm:$0xff]  ;;  %v97_v46 = vld [vmem:[%s1459_s1 + $0x218] sm:$0xff] }
  0x26   :  { %372 = vmatpush.msrb.mxu0 %v107_v6  ;;  %391 = vmatpush.msrb.mxu1 %v124_v7  ;;  %v114_v47 = vld [vmem:[%s1459_s1 + $0x2a0] sm:$0xff]  ;;  %v129_v48 = vld [vmem:[%s1459_s1 + $0x318] sm:$0xff]  ;;  %v96_v50 = vld [vmem:[%s1459_s1 + $0x210] sm:$0xff] }
  0x27   :  { %412 = vmatpush.msrb.mxu2 %v139_v8  ;;  %431 = vmatpush.msrb.mxu3 %v156_v9  ;;  %v146_v49 = vld [vmem:[%s1459_s1 + $0x3a0] sm:$0xff]  ;;  %v113_v51 = vld [vmem:[%s1459_s1 + $0x298] sm:$0xff]  ;;  %v128_v52 = vld [vmem:[%s1459_s1 + $0x310] sm:$0xff] }
  0x28   :  { %373 = vmatpush.msrb.mxu0 %v106_v10  ;;  %392 = vmatpush.msrb.mxu1 %v123_v11  ;;  %v145_v53 = vld [vmem:[%s1459_s1 + $0x398] sm:$0xff]  ;;  %v95_v54 = vld [vmem:[%s1459_s1 + $0x208] sm:$0xff]  ;;  %v112_v55 = vld [vmem:[%s1459_s1 + $0x290] sm:$0xff] }
  0x29   :  { %413 = vmatpush.msrb.mxu2 %v138_v12  ;;  %432 = vmatpush.msrb.mxu3 %v155_v13  ;;  %v127_v56 = vld [vmem:[%s1459_s1 + $0x308] sm:$0xff]  ;;  %v144_v57 = vld [vmem:[%s1459_s1 + $0x390] sm:$0xff]  ;;  %v94_v58 = vld [vmem:[%s1459_s1 + $0x200] sm:$0xff] }
  0x2a   :  { %374 = vmatpush.msrb.mxu0 %v105_v14  ;;  %393 = vmatpush.msrb.mxu1 %v122_v15  ;;  %v111_v59 = vld [vmem:[%s1459_s1 + $0x288] sm:$0xff]  ;;  %v126_v60 = vld [vmem:[%s1459_s1 + $0x300] sm:$0xff]  ;;  %v16_v63 = vld [vmem:[%s1460_s0 + $0x10] sm:$0xff] }
  0x2b   :  { %414 = vmatpush.msrb.mxu2 %v137_v16  ;;  %433 = vmatpush.msrb.mxu3 %v154_v17  ;;  %v143_v61 = vld [vmem:[%s1459_s1 + $0x388] sm:$0xff]  ;;  %v14_v62 = vld [vmem:[%s1460_s0] sm:$0xff]  ;;  %v173_v0 = vld [vmem:[%s1459_s1 + $0x478] sm:$0xff] }
  0x2c   :  { %375 = vmatpush.msrb.mxu0 %v104_v18  ;;  %394 = vmatpush.msrb.mxu1 %v121_v19  ;;  %v205_v1 = vld [vmem:[%s1459_s1 + $0x578] sm:$0xff]  ;;  %v110_v2 = vld [vmem:[%s1459_s1 + $0x280] sm:$0xff]  ;;  %v15_v4 = vld [vmem:[%s1460_s0 + $0x8] sm:$0xff] }
  0x2d   :  { %415 = vmatpush.msrb.mxu2 %v136_v20  ;;  %434 = vmatpush.msrb.mxu3 %v153_v21  ;;  %v142_v3 = vld [vmem:[%s1459_s1 + $0x380] sm:$0xff]  ;;  %v17_v5 = vld [vmem:[%s1460_s0 + $0x18] sm:$0xff]  ;;  %v172_v6 = vld [vmem:[%s1459_s1 + $0x470] sm:$0xff] }
  0x2e   :  { %376 = vmatpush.msrb.mxu0 %v103_v22  ;;  %395 = vmatpush.msrb.mxu1 %v120_v23  ;;  %v189_v7 = vld [vmem:[%s1459_s1 + $0x4f8] sm:$0xff]  ;;  %v204_v8 = vld [vmem:[%s1459_s1 + $0x570] sm:$0xff]  ;;  %v171_v10 = vld [vmem:[%s1459_s1 + $0x468] sm:$0xff] }
  0x2f   :  { %416 = vmatpush.msrb.mxu2 %v135_v24  ;;  %435 = vmatpush.msrb.mxu3 %v152_v25  ;;  %v221_v9 = vld [vmem:[%s1459_s1 + $0x5f8] sm:$0xff]  ;;  %v188_v11 = vld [vmem:[%s1459_s1 + $0x4f0] sm:$0xff]  ;;  %v203_v12 = vld [vmem:[%s1459_s1 + $0x568] sm:$0xff] }
  0x30   :  { %377 = vmatpush.msrb.mxu0 %v102_v26  ;;  %396 = vmatpush.msrb.mxu1 %v119_v27  ;;  %v220_v13 = vld [vmem:[%s1459_s1 + $0x5f0] sm:$0xff]  ;;  %v170_v14 = vld [vmem:[%s1459_s1 + $0x460] sm:$0xff]  ;;  %v187_v15 = vld [vmem:[%s1459_s1 + $0x4e8] sm:$0xff] }
  0x31   :  { %417 = vmatpush.msrb.mxu2 %v134_v28  ;;  %436 = vmatpush.msrb.mxu3 %v151_v29  ;;  %v202_v16 = vld [vmem:[%s1459_s1 + $0x560] sm:$0xff]  ;;  %v219_v17 = vld [vmem:[%s1459_s1 + $0x5e8] sm:$0xff]  ;;  %v20_v18 = vld [vmem:[%s1460_s0 + $0x30] sm:$0xff] }
  0x32   :  { %378 = vmatpush.msrb.mxu0 %v101_v30  ;;  %397 = vmatpush.msrb.mxu1 %v118_v31  ;;  %v169_v19 = vld [vmem:[%s1459_s1 + $0x458] sm:$0xff]  ;;  %v186_v20 = vld [vmem:[%s1459_s1 + $0x4e0] sm:$0xff]  ;;  %v168_v25 = vld [vmem:[%s1459_s1 + $0x450] sm:$0xff] }
  0x33   :  { %418 = vmatpush.msrb.mxu2 %v133_v32  ;;  %437 = vmatpush.msrb.mxu3 %v150_v33  ;;  %v201_v21 = vld [vmem:[%s1459_s1 + $0x558] sm:$0xff]  ;;  %v218_v22 = vld [vmem:[%s1459_s1 + $0x5e0] sm:$0xff]  ;;  %v200_v27 = vld [vmem:[%s1459_s1 + $0x550] sm:$0xff] }
  0x34   :  { %379 = vmatpush.msrb.mxu0 %v100_v34  ;;  %398 = vmatpush.msrb.mxu1 %v117_v35  ;;  %v18_v23 = vld [vmem:[%s1460_s0 + $0x20] sm:$0xff]  ;;  %v21_v24 = vld [vmem:[%s1460_s0 + $0x38] sm:$0xff]  ;;  %v19_v29 = vld [vmem:[%s1460_s0 + $0x28] sm:$0xff] }
  0x35   :  { %419 = vmatpush.msrb.mxu2 %v132_v36  ;;  %438 = vmatpush.msrb.mxu3 %v149_v37  ;;  %v185_v26 = vld [vmem:[%s1459_s1 + $0x4d8] sm:$0xff]  ;;  %v167_v30 = vld [vmem:[%s1459_s1 + $0x448] sm:$0xff]  ;;  %v184_v31 = vld [vmem:[%s1459_s1 + $0x4d0] sm:$0xff] }
  0x36   :  { %380 = vmatpush.msrb.mxu0 %v99_v38  ;;  %399 = vmatpush.msrb.mxu1 %v116_v39  ;;  %v217_v28 = vld [vmem:[%s1459_s1 + $0x5d8] sm:$0xff]  ;;  %v199_v32 = vld [vmem:[%s1459_s1 + $0x548] sm:$0xff]  ;;  %v216_v33 = vld [vmem:[%s1459_s1 + $0x5d0] sm:$0xff] }
  0x37   :  { %420 = vmatpush.msrb.mxu2 %v131_v40  ;;  %439 = vmatpush.msrb.mxu3 %v148_v41  ;;  %v166_v34 = vld [vmem:[%s1459_s1 + $0x440] sm:$0xff]  ;;  %v183_v35 = vld [vmem:[%s1459_s1 + $0x4c8] sm:$0xff]  ;;  %v165_v38 = vld [vmem:[%s1459_s1 + $0x438] sm:$0xff] }
  0x38   :  { %381 = vmatpush.msrb.mxu0 %v98_v42  ;;  %400 = vmatpush.msrb.mxu1 %v115_v43  ;;  %v198_v36 = vld [vmem:[%s1459_s1 + $0x540] sm:$0xff]  ;;  %v215_v37 = vld [vmem:[%s1459_s1 + $0x5c8] sm:$0xff]  ;;  %v197_v40 = vld [vmem:[%s1459_s1 + $0x538] sm:$0xff] }
  0x39   :  { %421 = vmatpush.msrb.mxu2 %v130_v44  ;;  %440 = vmatpush.msrb.mxu3 %v147_v45  ;;  %v182_v39 = vld [vmem:[%s1459_s1 + $0x4c0] sm:$0xff]  ;;  %v164_v42 = vld [vmem:[%s1459_s1 + $0x430] sm:$0xff]  ;;  %v181_v43 = vld [vmem:[%s1459_s1 + $0x4b8] sm:$0xff] }
  0x3a   :  { %382 = vmatpush.msrb.mxu0 %v97_v46  ;;  %401 = vmatpush.msrb.mxu1 %v114_v47  ;;  %v214_v41 = vld [vmem:[%s1459_s1 + $0x5c0] sm:$0xff]  ;;  %v196_v44 = vld [vmem:[%s1459_s1 + $0x530] sm:$0xff]  ;;  %v213_v45 = vld [vmem:[%s1459_s1 + $0x5b8] sm:$0xff] }
  0x3b   :  { %422 = vmatpush.msrb.mxu2 %v129_v48  ;;  %441 = vmatpush.msrb.mxu3 %v146_v49  ;;  %v163_v46 = vld [vmem:[%s1459_s1 + $0x428] sm:$0xff]  ;;  %v180_v47 = vld [vmem:[%s1459_s1 + $0x4b0] sm:$0xff] }
  0x3c   :  { %383 = vmatpush.msrb.mxu0 %v96_v50  ;;  %402 = vmatpush.msrb.mxu1 %v113_v51  ;;  %v195_v48 = vld [vmem:[%s1459_s1 + $0x528] sm:$0xff]  ;;  %v212_v49 = vld [vmem:[%s1459_s1 + $0x5b0] sm:$0xff]  ;;  %v162_v50 = vld [vmem:[%s1459_s1 + $0x420] sm:$0xff] }
  0x3d   :  { %423 = vmatpush.msrb.mxu2 %v128_v52  ;;  %442 = vmatpush.msrb.mxu3 %v145_v53  ;;  %v179_v51 = vld [vmem:[%s1459_s1 + $0x4a8] sm:$0xff]  ;;  %v194_v52 = vld [vmem:[%s1459_s1 + $0x520] sm:$0xff] }
  0x3e   :  { %384 = vmatpush.msrb.mxu0 %v95_v54  ;;  %403 = vmatpush.msrb.mxu1 %v112_v55  ;;  %v211_v53 = vld [vmem:[%s1459_s1 + $0x5a8] sm:$0xff]  ;;  %v161_v54 = vld [vmem:[%s1459_s1 + $0x418] sm:$0xff]  ;;  %v178_v55 = vld [vmem:[%s1459_s1 + $0x4a0] sm:$0xff] }
  0x3f   :  { %424 = vmatpush.msrb.mxu2 %v127_v56  ;;  %443 = vmatpush.msrb.mxu3 %v144_v57  ;;  %v193_v56 = vld [vmem:[%s1459_s1 + $0x518] sm:$0xff]  ;;  %v210_v57 = vld [vmem:[%s1459_s1 + $0x5a0] sm:$0xff] }
  0x40   :  { %385 = vmatpush.msrb.mxu0 %v94_v58  ;;  %404 = vmatpush.msrb.mxu1 %v111_v59  ;;  %v160_v58 = vld [vmem:[%s1459_s1 + $0x410] sm:$0xff]  ;;  %v177_v59 = vld [vmem:[%s1459_s1 + $0x498] sm:$0xff] }
  0x41   :  { %425 = vmatpush.msrb.mxu2 %v126_v60  ;;  %444 = vmatpush.msrb.mxu3 %v143_v61  ;;  %v192_v60 = vld [vmem:[%s1459_s1 + $0x510] sm:$0xff]  ;;  %v209_v61 = vld [vmem:[%s1459_s1 + $0x598] sm:$0xff] }
  0x42   :  { %306 = vmatmul.f32.vlgmr.msra.gmra.mxu0 %v14_v62  ;;  %346 = vmatmul.f32.vlgmr.msra.gmra.mxu2 %v16_v63  ;;  %v159_v62 = vld [vmem:[%s1459_s1 + $0x408] sm:$0xff]  ;;  %v176_v63 = vld [vmem:[%s1459_s1 + $0x490] sm:$0xff] }
  0x43   :  { %450 = vmatpush.msra.mxu0 %v173_v0  ;;  %490 = vmatpush.msra.mxu2 %v205_v1  ;;  %v191_v0 = vld [vmem:[%s1459_s1 + $0x508] sm:$0xff]  ;;  %v208_v1 = vld [vmem:[%s1459_s1 + $0x590] sm:$0xff] }
  0x44   :  { %405 = vmatpush.msrb.mxu1 %v110_v2  ;;  %445 = vmatpush.msrb.mxu3 %v142_v3  ;;  %v158_v2 = vld [vmem:[%s1459_s1 + $0x400] sm:$0xff]  ;;  %v175_v3 = vld [vmem:[%s1459_s1 + $0x488] sm:$0xff] }
  0x45   :  { %326 = vmatmul.f32.vlgmr.msra.gmra.mxu1 %v15_v4  ;;  %366 = vmatmul.f32.vlgmr.msra.gmra.mxu3 %v17_v5  ;;  %v190_v4 = vld [vmem:[%s1459_s1 + $0x500] sm:$0xff]  ;;  %v207_v5 = vld [vmem:[%s1459_s1 + $0x588] sm:$0xff] }
  0x46   :  { %451 = vmatpush.msra.mxu0 %v172_v6  ;;  %470 = vmatpush.msra.mxu1 %v189_v7  ;;  %v22_v6 = vld [vmem:[%s1460_s0 + $0x40] sm:$0xff]  ;;  %v24_v7 = vld [vmem:[%s1460_s0 + $0x50] sm:$0xff] }
  0x47   :  { %491 = vmatpush.msra.mxu2 %v204_v8  ;;  %510 = vmatpush.msra.mxu3 %v221_v9  ;;  %v237_v8 = vld [vmem:[%s1459_s1 + $0x678] sm:$0xff] }
  0x48   :  { %452 = vmatpush.msra.mxu0 %v171_v10  ;;  %471 = vmatpush.msra.mxu1 %v188_v11  ;;  %v269_v9 = vld [vmem:[%s1459_s1 + $0x778] sm:$0xff]  ;;  %v174_v10 = vld [vmem:[%s1459_s1 + $0x480] sm:$0xff] }
  0x49   :  { %492 = vmatpush.msra.mxu2 %v203_v12  ;;  %511 = vmatpush.msra.mxu3 %v220_v13  ;;  %v206_v11 = vld [vmem:[%s1459_s1 + $0x580] sm:$0xff]  ;;  %v23_v12 = vld [vmem:[%s1460_s0 + $0x48] sm:$0xff]  ;;  %v25_v13 = vld [vmem:[%s1460_s0 + $0x58] sm:$0xff] }
  0x4a   :  { %453 = vmatpush.msra.mxu0 %v170_v14  ;;  %472 = vmatpush.msra.mxu1 %v187_v15  ;;  %v236_v14 = vld [vmem:[%s1459_s1 + $0x670] sm:$0xff]  ;;  %v253_v15 = vld [vmem:[%s1459_s1 + $0x6f8] sm:$0xff] }
  0x4b   :  { %493 = vmatpush.msra.mxu2 %v202_v16  ;;  %512 = vmatpush.msra.mxu3 %v219_v17  ;;  %v268_v16 = vld [vmem:[%s1459_s1 + $0x770] sm:$0xff]  ;;  %v285_v17 = vld [vmem:[%s1459_s1 + $0x7f8] sm:$0xff] }
  0x4c   :  { %426 = vmatmul.f32.vlgmr.msrb.gmra.mxu2 %v20_v18  ;;  %454 = vmatpush.msra.mxu0 %v169_v19  ;;  %v235_v18 = vld [vmem:[%s1459_s1 + $0x668] sm:$0xff]  ;;  %v252_v19 = vld [vmem:[%s1459_s1 + $0x6f0] sm:$0xff] }
  0x4d   :  { %473 = vmatpush.msra.mxu1 %v186_v20  ;;  %494 = vmatpush.msra.mxu2 %v201_v21  ;;  %v267_v20 = vld [vmem:[%s1459_s1 + $0x768] sm:$0xff]  ;;  %v284_v21 = vld [vmem:[%s1459_s1 + $0x7f0] sm:$0xff] }
  0x4e   :  { %513 = vmatpush.msra.mxu3 %v218_v22  ;;  %386 = vmatmul.f32.vlgmr.msrb.gmra.mxu0 %v18_v23  ;;  %v234_v22 = vld [vmem:[%s1459_s1 + $0x660] sm:$0xff]  ;;  %v251_v23 = vld [vmem:[%s1459_s1 + $0x6e8] sm:$0xff] }
  0x4f   :  { %446 = vmatmul.f32.vlgmr.msrb.gmra.mxu3 %v21_v24  ;;  %455 = vmatpush.msra.mxu0 %v168_v25  ;;  %v266_v24 = vld [vmem:[%s1459_s1 + $0x760] sm:$0xff]  ;;  %v283_v25 = vld [vmem:[%s1459_s1 + $0x7e8] sm:$0xff] }
  0x50   :  { %474 = vmatpush.msra.mxu1 %v185_v26  ;;  %495 = vmatpush.msra.mxu2 %v200_v27  ;;  %v233_v26 = vld [vmem:[%s1459_s1 + $0x658] sm:$0xff]  ;;  %v250_v27 = vld [vmem:[%s1459_s1 + $0x6e0] sm:$0xff] }
  0x51   :  { %514 = vmatpush.msra.mxu3 %v217_v28  ;;  %406 = vmatmul.f32.vlgmr.msrb.gmra.mxu1 %v19_v29  ;;  %v265_v28 = vld [vmem:[%s1459_s1 + $0x758] sm:$0xff]  ;;  %v282_v29 = vld [vmem:[%s1459_s1 + $0x7e0] sm:$0xff] }
  0x52   :  { %456 = vmatpush.msra.mxu0 %v167_v30  ;;  %475 = vmatpush.msra.mxu1 %v184_v31  ;;  %v232_v30 = vld [vmem:[%s1459_s1 + $0x650] sm:$0xff]  ;;  %v249_v31 = vld [vmem:[%s1459_s1 + $0x6d8] sm:$0xff] }
  0x53   :  { %496 = vmatpush.msra.mxu2 %v199_v32  ;;  %515 = vmatpush.msra.mxu3 %v216_v33  ;;  %v264_v32 = vld [vmem:[%s1459_s1 + $0x750] sm:$0xff]  ;;  %v281_v33 = vld [vmem:[%s1459_s1 + $0x7d8] sm:$0xff] }
  0x54   :  { %457 = vmatpush.msra.mxu0 %v166_v34  ;;  %476 = vmatpush.msra.mxu1 %v183_v35  ;;  %v231_v34 = vld [vmem:[%s1459_s1 + $0x648] sm:$0xff]  ;;  %v248_v35 = vld [vmem:[%s1459_s1 + $0x6d0] sm:$0xff] }
  0x55   :  { %497 = vmatpush.msra.mxu2 %v198_v36  ;;  %516 = vmatpush.msra.mxu3 %v215_v37  ;;  %v263_v36 = vld [vmem:[%s1459_s1 + $0x748] sm:$0xff]  ;;  %v280_v37 = vld [vmem:[%s1459_s1 + $0x7d0] sm:$0xff] }
  0x56   :  { %458 = vmatpush.msra.mxu0 %v165_v38  ;;  %477 = vmatpush.msra.mxu1 %v182_v39  ;;  %v230_v38 = vld [vmem:[%s1459_s1 + $0x640] sm:$0xff]  ;;  %v247_v39 = vld [vmem:[%s1459_s1 + $0x6c8] sm:$0xff] }
  0x57   :  { %498 = vmatpush.msra.mxu2 %v197_v40  ;;  %517 = vmatpush.msra.mxu3 %v214_v41  ;;  %v262_v40 = vld [vmem:[%s1459_s1 + $0x740] sm:$0xff]  ;;  %v279_v41 = vld [vmem:[%s1459_s1 + $0x7c8] sm:$0xff] }
  0x58   :  { %459 = vmatpush.msra.mxu0 %v164_v42  ;;  %478 = vmatpush.msra.mxu1 %v181_v43  ;;  %v229_v42 = vld [vmem:[%s1459_s1 + $0x638] sm:$0xff]  ;;  %v246_v43 = vld [vmem:[%s1459_s1 + $0x6c0] sm:$0xff] }
  0x59   :  { %499 = vmatpush.msra.mxu2 %v196_v44  ;;  %518 = vmatpush.msra.mxu3 %v213_v45  ;;  %v261_v44 = vld [vmem:[%s1459_s1 + $0x738] sm:$0xff]  ;;  %v278_v45 = vld [vmem:[%s1459_s1 + $0x7c0] sm:$0xff] }
  0x5a   :  { %460 = vmatpush.msra.mxu0 %v163_v46  ;;  %479 = vmatpush.msra.mxu1 %v180_v47  ;;  %v228_v46 = vld [vmem:[%s1459_s1 + $0x630] sm:$0xff]  ;;  %v245_v47 = vld [vmem:[%s1459_s1 + $0x6b8] sm:$0xff] }
  0x5b   :  { %500 = vmatpush.msra.mxu2 %v195_v48  ;;  %519 = vmatpush.msra.mxu3 %v212_v49  ;;  %v260_v48 = vld [vmem:[%s1459_s1 + $0x730] sm:$0xff]  ;;  %v277_v49 = vld [vmem:[%s1459_s1 + $0x7b8] sm:$0xff] }
  0x5c   :  { %461 = vmatpush.msra.mxu0 %v162_v50  ;;  %480 = vmatpush.msra.mxu1 %v179_v51  ;;  %v227_v50 = vld [vmem:[%s1459_s1 + $0x628] sm:$0xff]  ;;  %v244_v51 = vld [vmem:[%s1459_s1 + $0x6b0] sm:$0xff] }
  0x5d   :  { %501 = vmatpush.msra.mxu2 %v194_v52  ;;  %520 = vmatpush.msra.mxu3 %v211_v53  ;;  %v259_v52 = vld [vmem:[%s1459_s1 + $0x728] sm:$0xff]  ;;  %v276_v53 = vld [vmem:[%s1459_s1 + $0x7b0] sm:$0xff] }
  0x5e   :  { %462 = vmatpush.msra.mxu0 %v161_v54  ;;  %481 = vmatpush.msra.mxu1 %v178_v55  ;;  %v226_v54 = vld [vmem:[%s1459_s1 + $0x620] sm:$0xff]  ;;  %v243_v55 = vld [vmem:[%s1459_s1 + $0x6a8] sm:$0xff] }
  0x5f   :  { %502 = vmatpush.msra.mxu2 %v193_v56  ;;  %521 = vmatpush.msra.mxu3 %v210_v57  ;;  %v258_v56 = vld [vmem:[%s1459_s1 + $0x720] sm:$0xff]  ;;  %v275_v57 = vld [vmem:[%s1459_s1 + $0x7a8] sm:$0xff] }
  0x60   :  { %463 = vmatpush.msra.mxu0 %v160_v58  ;;  %482 = vmatpush.msra.mxu1 %v177_v59  ;;  %v225_v58 = vld [vmem:[%s1459_s1 + $0x618] sm:$0xff]  ;;  %v242_v59 = vld [vmem:[%s1459_s1 + $0x6a0] sm:$0xff] }
  0x61   :  { %503 = vmatpush.msra.mxu2 %v192_v60  ;;  %522 = vmatpush.msra.mxu3 %v209_v61  ;;  %v257_v60 = vld [vmem:[%s1459_s1 + $0x718] sm:$0xff]  ;;  %v274_v61 = vld [vmem:[%s1459_s1 + $0x7a0] sm:$0xff] }
  0x62   :  { %464 = vmatpush.msra.mxu0 %v159_v62  ;;  %483 = vmatpush.msra.mxu1 %v176_v63  ;;  %v224_v62 = vld [vmem:[%s1459_s1 + $0x610] sm:$0xff]  ;;  %v241_v63 = vld [vmem:[%s1459_s1 + $0x698] sm:$0xff] }
  0x63   :  { %504 = vmatpush.msra.mxu2 %v191_v0  ;;  %523 = vmatpush.msra.mxu3 %v208_v1  ;;  %v256_v0 = vld [vmem:[%s1459_s1 + $0x710] sm:$0xff]  ;;  %v273_v1 = vld [vmem:[%s1459_s1 + $0x798] sm:$0xff] }
  0x64   :  { %465 = vmatpush.msra.mxu0 %v158_v2  ;;  %484 = vmatpush.msra.mxu1 %v175_v3  ;;  %v223_v2 = vld [vmem:[%s1459_s1 + $0x608] sm:$0xff]  ;;  %v240_v3 = vld [vmem:[%s1459_s1 + $0x690] sm:$0xff] }
  0x65   :  { %505 = vmatpush.msra.mxu2 %v190_v4  ;;  %524 = vmatpush.msra.mxu3 %v207_v5  ;;  %v255_v4 = vld [vmem:[%s1459_s1 + $0x708] sm:$0xff]  ;;  %v272_v5 = vld [vmem:[%s1459_s1 + $0x790] sm:$0xff] }
  0x66   :  { %466 = vmatmul.f32.vlgmr.msra.gmra.mxu0 %v22_v6  ;;  %506 = vmatmul.f32.vlgmr.msra.gmra.mxu2 %v24_v7  ;;  %v222_v6 = vld [vmem:[%s1459_s1 + $0x600] sm:$0xff]  ;;  %v239_v7 = vld [vmem:[%s1459_s1 + $0x688] sm:$0xff] }
  0x67   :  { %530 = vmatpush.msrb.mxu0 %v237_v8  ;;  %570 = vmatpush.msrb.mxu2 %v269_v9  ;;  %v254_v8 = vld [vmem:[%s1459_s1 + $0x700] sm:$0xff]  ;;  %v271_v9 = vld [vmem:[%s1459_s1 + $0x788] sm:$0xff] }
  0x68   :  { %485 = vmatpush.msra.mxu1 %v174_v10  ;;  %525 = vmatpush.msra.mxu3 %v206_v11  ;;  %v26_v10 = vld [vmem:[%s1460_s0 + $0x60] sm:$0xff]  ;;  %v28_v11 = vld [vmem:[%s1460_s0 + $0x70] sm:$0xff] }
  0x69   :  { %486 = vmatmul.f32.vlgmr.msra.gmra.mxu1 %v23_v12  ;;  %526 = vmatmul.f32.vlgmr.msra.gmra.mxu3 %v25_v13  ;;  %v238_v12 = vld [vmem:[%s1459_s1 + $0x680] sm:$0xff] }
  0x6a   :  { %531 = vmatpush.msrb.mxu0 %v236_v14  ;;  %550 = vmatpush.msrb.mxu1 %v253_v15  ;;  %v270_v13 = vld [vmem:[%s1459_s1 + $0x780] sm:$0xff]  ;;  %v27_v14 = vld [vmem:[%s1460_s0 + $0x68] sm:$0xff]  ;;  %v29_v15 = vld [vmem:[%s1460_s0 + $0x78] sm:$0xff] }
  0x6b   :  { %571 = vmatpush.msrb.mxu2 %v268_v16  ;;  %590 = vmatpush.msrb.mxu3 %v285_v17  ;;  %v616_v16 = vld [vmem:[%s1461_s2] ss:$0 sm:$0xff] }
  0x6c   :  { %532 = vmatpush.msrb.mxu0 %v235_v18  ;;  %551 = vmatpush.msrb.mxu1 %v252_v19 }
  0x6d   :  { %572 = vmatpush.msrb.mxu2 %v267_v20  ;;  %591 = vmatpush.msrb.mxu3 %v284_v21 }
  0x6e   :  { %533 = vmatpush.msrb.mxu0 %v234_v22  ;;  %552 = vmatpush.msrb.mxu1 %v251_v23 }
  0x6f   :  { %573 = vmatpush.msrb.mxu2 %v266_v24  ;;  %592 = vmatpush.msrb.mxu3 %v283_v25 }
  0x70   :  { %534 = vmatpush.msrb.mxu0 %v233_v26  ;;  %553 = vmatpush.msrb.mxu1 %v250_v27 }
  0x71   :  { %574 = vmatpush.msrb.mxu2 %v265_v28  ;;  %593 = vmatpush.msrb.mxu3 %v282_v29 }
  0x72   :  { %535 = vmatpush.msrb.mxu0 %v232_v30  ;;  %554 = vmatpush.msrb.mxu1 %v249_v31 }
  0x73   :  { %575 = vmatpush.msrb.mxu2 %v264_v32  ;;  %594 = vmatpush.msrb.mxu3 %v281_v33 }
  0x74   :  { %536 = vmatpush.msrb.mxu0 %v231_v34  ;;  %555 = vmatpush.msrb.mxu1 %v248_v35 }
  0x75   :  { %576 = vmatpush.msrb.mxu2 %v263_v36  ;;  %595 = vmatpush.msrb.mxu3 %v280_v37 }
  0x76   :  { %537 = vmatpush.msrb.mxu0 %v230_v38  ;;  %556 = vmatpush.msrb.mxu1 %v247_v39 }
  0x77   :  { %577 = vmatpush.msrb.mxu2 %v262_v40  ;;  %596 = vmatpush.msrb.mxu3 %v279_v41 }
  0x78   :  { %538 = vmatpush.msrb.mxu0 %v229_v42  ;;  %557 = vmatpush.msrb.mxu1 %v246_v43 }
  0x79   :  { %578 = vmatpush.msrb.mxu2 %v261_v44  ;;  %597 = vmatpush.msrb.mxu3 %v278_v45 }
  0x7a   :  { %539 = vmatpush.msrb.mxu0 %v228_v46  ;;  %558 = vmatpush.msrb.mxu1 %v245_v47 }
  0x7b   :  { %579 = vmatpush.msrb.mxu2 %v260_v48  ;;  %598 = vmatpush.msrb.mxu3 %v277_v49 }
  0x7c   :  { %540 = vmatpush.msrb.mxu0 %v227_v50  ;;  %559 = vmatpush.msrb.mxu1 %v244_v51 }
  0x7d   :  { %580 = vmatpush.msrb.mxu2 %v259_v52  ;;  %599 = vmatpush.msrb.mxu3 %v276_v53 }
  0x7e   :  { %541 = vmatpush.msrb.mxu0 %v226_v54  ;;  %560 = vmatpush.msrb.mxu1 %v243_v55 }
  0x7f   :  { %581 = vmatpush.msrb.mxu2 %v258_v56  ;;  %600 = vmatpush.msrb.mxu3 %v275_v57 }
  0x80   :  { %542 = vmatpush.msrb.mxu0 %v225_v58  ;;  %561 = vmatpush.msrb.mxu1 %v242_v59 }
  0x81   :  { %582 = vmatpush.msrb.mxu2 %v257_v60  ;;  %601 = vmatpush.msrb.mxu3 %v274_v61 }
  0x82   :  { %543 = vmatpush.msrb.mxu0 %v224_v62  ;;  %562 = vmatpush.msrb.mxu1 %v241_v63 }
  0x83   :  { %583 = vmatpush.msrb.mxu2 %v256_v0  ;;  %602 = vmatpush.msrb.mxu3 %v273_v1 }
  0x84   :  { %544 = vmatpush.msrb.mxu0 %v223_v2  ;;  %563 = vmatpush.msrb.mxu1 %v240_v3 }
  0x85   :  { %584 = vmatpush.msrb.mxu2 %v255_v4  ;;  %603 = vmatpush.msrb.mxu3 %v272_v5 }
  0x86   :  { %545 = vmatpush.msrb.mxu0 %v222_v6  ;;  %564 = vmatpush.msrb.mxu1 %v239_v7 }
  0x87   :  { %585 = vmatpush.msrb.mxu2 %v254_v8  ;;  %604 = vmatpush.msrb.mxu3 %v271_v9 }
  0x88   :  { %546 = vmatmul.f32.vlgmr.msrb.gmra.mxu0 %v26_v10  ;;  %586 = vmatmul.f32.vlgmr.msrb.gmra.mxu2 %v28_v11 }
  0x89   :  { %565 = vmatpush.msrb.mxu1 %v238_v12  ;;  %605 = vmatpush.msrb.mxu3 %v270_v13 }
  0x8a   :  { %566 = vmatmul.f32.vlgmr.msrb.gmra.mxu1 %v27_v14  ;;  %606 = vmatmul.f32.vlgmr.msrb.gmra.mxu3 %v29_v15 }
  0xbf   :  { %v307_v17 = vpop.f32.mrf.mxu0 }
  0xc0   :  { %v308_v18 = vadd.f32 %v616_v16, %v307_v17 }
  0xc2   :  { %v327_v19 = vpop.f32.mrf.mxu1 }
  0xc3   :  { %v328_v20 = vadd.f32 %v327_v19, %v308_v18 }
  0xc5   :  { %v347_v21 = vpop.f32.mrf.mxu2 }
  0xc6   :  { %v348_v22 = vadd.f32 %v347_v21, %v328_v20 }
  0xc8   :  { %v367_v23 = vpop.f32.mrf.mxu3 }
  0xc9   :  { %v368_v24 = vadd.f32 %v367_v23, %v348_v22 }
  0xcb   :  { %v387_v25 = vpop.f32.mrf.mxu0 }
  0xcc   :  { %v388_v26 = vadd.f32 %v387_v25, %v368_v24 }
  0xce   :  { %v407_v27 = vpop.f32.mrf.mxu1 }
  0xcf   :  { %v408_v28 = vadd.f32 %v407_v27, %v388_v26  ;;  %v427_v29 = vpop.f32.mrf.mxu2 }
  0xd1   :  { %v428_v30 = vadd.f32 %v427_v29, %v408_v28 }
  0xd2   :  { %v447_v31 = vpop.f32.mrf.mxu3 }
  0xd3   :  { %v448_v33 = vadd.f32 %v447_v31, %v428_v30 }
  0xe3   :  { %v467_v32 = vpop.f32.mrf.mxu0 }
  0xe4   :  { %v468_v34 = vadd.f32 %v467_v32, %v448_v33 }
  0xe6   :  { %v487_v35 = vpop.f32.mrf.mxu1 }
  0xe7   :  { %v488_v37 = vadd.f32 %v487_v35, %v468_v34 }
  0xe9   :  { %v507_v36 = vpop.f32.mrf.mxu2 }
  0xea   :  { %v508_v38 = vadd.f32 %v507_v36, %v488_v37 }
  0xec   :  { %v527_v39 = vpop.f32.mrf.mxu3 }
  0xed   :  { %v528_v40 = vadd.f32 %v527_v39, %v508_v38 }
 0x105   :  { %v547_v41 = vpop.f32.mrf.mxu0 }
 0x106   :  { %v548_v42 = vadd.f32 %v547_v41, %v528_v40 }
 0x107   :  { %v567_v43 = vpop.f32.mrf.mxu1 }
 0x108   :  { %v568_v44 = vadd.f32 %v567_v43, %v548_v42 }
 0x10b   :  { %v587_v45 = vpop.f32.mrf.mxu2 }
 0x10c   :  { %v588_v46 = vadd.f32 %v587_v45, %v568_v44 }
 0x10d   :  { %v607_v47 = vpop.f32.mrf.mxu3 }
 0x10e   :  { %v608_v48 = vadd.f32 %v607_v47, %v588_v46 }
 0x110   :  { %611 = vst.msk [vmem:[%s1462_s3] sm:$0xff] %vm610_vm0, %v608_v48 }

</bundles_post_ra>
